<compile_context>
chip_gen: v5e
topology: v5e:2x2
jax: 0.10.0
libtpu: 0.0.40
codegen_flags: <defaults>
</compile_context>

<pallas_src>
import functools

import jax
import jax.numpy as jnp
from jax import lax
from jax.experimental import pallas as pl
from jax.experimental.pallas import tpu as pltpu


_MAX_TM = 512                      # keeps every working set well under the v7x
                                   # 64 MiB physical VMEM (v5e/v6e have 128 MiB)
_VMEM_LIMIT = 64 * 1024 * 1024     # above the 32 MiB scoped default (review)


def _pick_tm(M, max_tm=_MAX_TM):
    """M-tile: multiple of 16 (bf16 sublane pack), divides M when possible, and
    gives >= 2 grid steps when M allows (so both v7x TensorCores get work)."""
    if M <= 16:
        return M
    best = 0
    t = 16
    while t <= min(max_tm, M // 2):
        if M % t == 0:
            best = t
        t += 16
    if best:
        return best
    # No suitable 16-multiple divisor: single full tile if it fits, else cap at
    # max_tm (trailing partial tile rows are computed on padding and dropped on
    # write -- correct, minor wasted work).
    return M if M <= max_tm else max_tm


# ----------------------------------------------------------------------------
# Pallas kernel: fused  out = relu?(x @ w + b)   (bf16 MXU, f32 epilogue)
# ----------------------------------------------------------------------------
def _mm_bias_kernel(x_ref, w_ref, b_ref, o_ref, *, relu):
    acc = jnp.dot(x_ref[...], w_ref[...], preferred_element_type=jnp.float32)
    acc = acc + b_ref[...]                 # (1, N) bias broadcast over rows
    if relu:
        acc = jnp.maximum(acc, 0.0)
    o_ref[...] = acc.astype(o_ref.dtype)


def matmul_bias(x, w, b, *, relu, out_dtype=jnp.float32):
    """x: (M, K), w: (K, N), b: (N,) -> (M, N). M is tiled; w/b stay resident."""
    M, K = x.shape
    K2, N = w.shape
    assert K == K2
    tm = _pick_tm(M)
    grid = (pl.cdiv(M, tm),)
    kernel = functools.partial(_mm_bias_kernel, relu=relu)
    return pl.pallas_call(
        kernel,
        out_shape=jax.ShapeDtypeStruct((M, N), out_dtype),
        grid=grid,
        in_specs=[
            pl.BlockSpec((tm, K), lambda i: (i, 0)),   # streamed activation tile
            pl.BlockSpec((K, N), lambda i: (0, 0)),    # resident weight
            pl.BlockSpec((1, N), lambda i: (0, 0)),    # resident bias
        ],
        out_specs=pl.BlockSpec((tm, N), lambda i: (i, 0)),
        compiler_params=pltpu.CompilerParams(
            dimension_semantics=("parallel",),
            vmem_limit_bytes=_VMEM_LIMIT),
    )(x.astype(jnp.bfloat16), w.astype(jnp.bfloat16),
      b.reshape(1, N).astype(jnp.float32))


# ----------------------------------------------------------------------------
# Pallas kernel: fused  out = relu(x @ w1 + b1) @ w2 + b2   (fc1 + fc2)
# ----------------------------------------------------------------------------
def _fused_fc_kernel(x_ref, w1_ref, b1_ref, w2_ref, b2_ref, o_ref):
    h = jnp.dot(x_ref[...], w1_ref[...], preferred_element_type=jnp.float32)
    h = jnp.maximum(h + b1_ref[...], 0.0)
    out = jnp.dot(h.astype(jnp.bfloat16), w2_ref[...],
                  preferred_element_type=jnp.float32)
    o_ref[...] = (out + b2_ref[...]).astype(o_ref.dtype)


def fused_fc(x, w1, b1, w2, b2):
    """x: (M, K), w1: (K, H), w2: (H, N) -> (M, N) in a single pallas_call."""
    M, K = x.shape
    K1, H = w1.shape
    H2, N = w2.shape
    assert K == K1 and H == H2
    tm = _pick_tm(M)
    grid = (pl.cdiv(M, tm),)
    return pl.pallas_call(
        _fused_fc_kernel,
        out_shape=jax.ShapeDtypeStruct((M, N), jnp.float32),
        grid=grid,
        in_specs=[
            pl.BlockSpec((tm, K), lambda i: (i, 0)),   # streamed activation tile
            pl.BlockSpec((K, H), lambda i: (0, 0)),    # resident fc1 weight
            pl.BlockSpec((1, H), lambda i: (0, 0)),
            pl.BlockSpec((H, N), lambda i: (0, 0)),    # resident fc2 weight
            pl.BlockSpec((1, N), lambda i: (0, 0)),
        ],
        out_specs=pl.BlockSpec((tm, N), lambda i: (i, 0)),
        compiler_params=pltpu.CompilerParams(
            dimension_semantics=("parallel",),
            vmem_limit_bytes=_VMEM_LIMIT),
    )(x.astype(jnp.bfloat16), w1.astype(jnp.bfloat16),
      b1.reshape(1, H).astype(jnp.float32),
      w2.astype(jnp.bfloat16), b2.reshape(1, N).astype(jnp.float32))


# ----------------------------------------------------------------------------
# im2col glue (pure slicing / stacking, no convolution compute)
# TODO(synk): move patch extraction into the Pallas conv kernel (see header).
# ----------------------------------------------------------------------------
def im2col(x_nhwc, k, stride):
    """(B, H, W, C) -> patches (B*Ho*Wo, k*k*C) in (kh, kw, C) flat order."""
    B, H, W, C = x_nhwc.shape
    Ho = (H - k) // stride + 1
    Wo = (W - k) // stride + 1
    patches = []
    for di in range(k):
        for dj in range(k):
            patches.append(
                x_nhwc[:, di:di + stride * Ho:stride, dj:dj + stride * Wo:stride, :])
    p = jnp.stack(patches, axis=3)            # (B, Ho, Wo, k*k, C)
    return p.reshape(B * Ho * Wo, k * k * C), (B, Ho, Wo)


# ----------------------------------------------------------------------------
# Parameter init (PyTorch layouts) and one-time prep into kernel-ready layouts
# ----------------------------------------------------------------------------
def _conv_out_dims(input_shape):
    C, H, W = input_shape
    H1, W1 = (H - 8) // 4 + 1, (W - 8) // 4 + 1
    H2, W2 = (H1 - 4) // 2 + 1, (W1 - 4) // 2 + 1
    return H2, W2, 64 * H2 * W2


def init_params(key, input_shape, n_actions):
    """PyTorch-layout parameters (Conv2d: OIHW, Linear: (out, in))."""
    C, _, _ = input_shape
    _, _, conv_out = _conv_out_dims(input_shape)
    ks = jax.random.split(key, 8)
    s = 0.05
    return {
        "w1": s * jax.random.normal(ks[0], (32, C, 8, 8), jnp.float32),
        "b1": s * jax.random.normal(ks[1], (32,), jnp.float32),
        "w2": s * jax.random.normal(ks[2], (64, 32, 4, 4), jnp.float32),
        "b2": s * jax.random.normal(ks[3], (64,), jnp.float32),
        "fw1": s * jax.random.normal(ks[4], (512, conv_out), jnp.float32),
        "fb1": s * jax.random.normal(ks[5], (512,), jnp.float32),
        "fw2": s * jax.random.normal(ks[6], (n_actions, 512), jnp.float32),
        "fb2": s * jax.random.normal(ks[7], (n_actions,), jnp.float32),
    }


def prepare_params(params, input_shape):
    """One-time conversion: matmul-ready (K, N) bf16 weights, NHWC flatten
    order for fc1 (no K padding -- full-K BlockSpec blocks are legal)."""
    C, _, _ = input_shape
    H2, W2, conv_out = _conv_out_dims(input_shape)
    # conv weights: (O, I, kh, kw) -> (kh, kw, I, O) -> (kh*kw*I, O)
    w1 = jnp.transpose(params["w1"], (2, 3, 1, 0)).reshape(8 * 8 * C, 32)
    w2 = jnp.transpose(params["w2"], (2, 3, 1, 0)).reshape(4 * 4 * 32, 64)
    # fc1: columns are in PyTorch NCHW flatten order (C, H, W); permute them to
    # NHWC (H, W, C) order and transpose to (conv_out, 512).
    fw1 = params["fw1"].reshape(512, 64, H2, W2)
    fw1 = jnp.transpose(fw1, (2, 3, 1, 0)).reshape(conv_out, 512)
    fw2 = jnp.transpose(params["fw2"], (1, 0))          # (512, n_actions)
    return {
        "w1": w1.astype(jnp.bfloat16), "b1": params["b1"].astype(jnp.float32),
        "w2": w2.astype(jnp.bfloat16), "b2": params["b2"].astype(jnp.float32),
        "fw1": fw1.astype(jnp.bfloat16), "fb1": params["fb1"].astype(jnp.float32),
        "fw2": fw2.astype(jnp.bfloat16), "fb2": params["fb2"].astype(jnp.float32),
    }


# ----------------------------------------------------------------------------
# DQN forward
# ----------------------------------------------------------------------------
def dqn_forward(x_nchw, prep):
    # Cast to bf16 BEFORE the layout transpose: halves the transpose's HBM bytes.
    x = jnp.transpose(x_nchw.astype(jnp.bfloat16), (0, 2, 3, 1))    # NCHW -> NHWC

    # conv1 + relu  (k=8, stride=4)
    p1, (B, H1, W1) = im2col(x, 8, 4)
    y1 = matmul_bias(p1, prep["w1"], prep["b1"], relu=True,
                     out_dtype=jnp.bfloat16).reshape(B, H1, W1, 32)

    # conv2 + relu  (k=4, stride=2)
    p2, (_, H2, W2) = im2col(y1, 4, 2)
    y2 = matmul_bias(p2, prep["w2"], prep["b2"], relu=True,
                     out_dtype=jnp.bfloat16)                         # (B*H2*W2, 64)

    # Flatten directly in NHWC (H, W, C) order (free reshape); fw1 columns were
    # permuted at prep time, and fw1 keeps the exact (unpadded) K dim.
    xf = y2.reshape(B, H2 * W2 * 64)

    # fused fc1 (relu) + fc2
    return fused_fc(xf, prep["fw1"], prep["fb1"], prep["fw2"], prep["fb2"])


# ----------------------------------------------------------------------------
# Pure-JAX reference (PyTorch semantics) for a numeric sanity check
# ----------------------------------------------------------------------------
def dqn_reference(x, params):
    dn = ("NCHW", "OIHW", "NCHW")
    y = lax.conv_general_dilated(x, params["w1"], (4, 4), "VALID",
                                 dimension_numbers=dn)
    y = jax.nn.relu(y + params["b1"][None, :, None, None])
    y = lax.conv_general_dilated(y, params["w2"], (2, 2), "VALID",
                                 dimension_numbers=dn)
    y = jax.nn.relu(y + params["b2"][None, :, None, None])
    y = y.reshape(y.shape[0], -1)                       # NCHW flatten (PyTorch)
    y = jax.nn.relu(y @ params["fw1"].T + params["fb1"])
    return y @ params["fw2"].T + params["fb2"]


if __name__ == "__main__":
    key = jax.random.PRNGKey(0)
    # small-but-valid shapes: batch=2, channels=4, spatial=32x32, n_actions=6
    # conv1: 32x32 -> 7x7, conv2: 7x7 -> 2x2, conv_out = 64*2*2 = 256
    input_shape = (4, 32, 32)
    n_actions = 6
    batch = 2

    pkey, xkey = jax.random.split(key)
    params = init_params(pkey, input_shape, n_actions)
    prep = prepare_params(params, input_shape)
    x = jax.random.normal(xkey, (batch,) + input_shape, jnp.float32)  # NCHW

    fwd = jax.jit(dqn_forward)
    out = jax.block_until_ready(fwd(x, prep))
    assert out.shape == (batch, n_actions), out.shape
    assert bool(jnp.all(jnp.isfinite(out)))

    # numeric sanity check vs. the f32 pure-JAX reference (bf16 MXU tolerance)
    ref = dqn_reference(x, params)
    assert bool(jnp.allclose(out, ref, rtol=0.05, atol=0.05)), (
        "mismatch vs reference", out, ref)

    print("KERNEL_OK")
</pallas_src>

<mosaic_0001>
module attributes {stable_mosaic.version = 11 : i64} {
  func.func @_mm_bias_kernel(%arg0: i32, %arg1: memref<98x256xbf16, #tpu.memory_space<vmem>>, %arg2: memref<256x32xbf16, #tpu.memory_space<vmem>>, %arg3: memref<1x32xf32, #tpu.memory_space<vmem>>, %arg4: memref<98x32xbf16, #tpu.memory_space<vmem>>) attributes {dimension_semantics = [#tpu.dimension_semantics<parallel>], iteration_bounds = array<i64: 1>, scalar_prefetch = 0 : i64, scratch_operands = 0 : i64, tpu.core_type = #tpu.core_type<tc>, window_params = [{transform_indices = @transform_0, window_bounds = array<i64: 98, 256>}, {pipeline_mode = #tpu.pipeline_mode<synchronous>, transform_indices = @transform_1, window_bounds = array<i64: 256, 32>}, {pipeline_mode = #tpu.pipeline_mode<synchronous>, transform_indices = @transform_2, window_bounds = array<i64: 1, 32>}, {transform_indices = @transform_3, window_bounds = array<i64: 98, 32>}]} {
    %c0 = arith.constant 0 : index
    %c0_0 = arith.constant 0 : index
    %0 = vector.load %arg1[%c0, %c0_0] : memref<98x256xbf16, #tpu.memory_space<vmem>>, vector<98x256xbf16>
    %c0_1 = arith.constant 0 : index
    %c0_2 = arith.constant 0 : index
    %1 = vector.load %arg2[%c0_1, %c0_2] : memref<256x32xbf16, #tpu.memory_space<vmem>>, vector<256x32xbf16>
    %cst = arith.constant dense<0.000000e+00> : vector<98x32xf32>
    %2 = tpu.matmul %0, %1, %cst {dimension_numbers = #tpu.dot_dimension_numbers<[1], [0], [0], [1], [0, 0, 1, 1], [], []>} : vector<98x256xbf16>, vector<256x32xbf16>, vector<98x32xf32> -> vector<98x32xf32>
    %c0_3 = arith.constant 0 : index
    %c0_4 = arith.constant 0 : index
    %3 = vector.load %arg3[%c0_3, %c0_4] : memref<1x32xf32, #tpu.memory_space<vmem>>, vector<1x32xf32>
    %4 = vector.broadcast %3 : vector<1x32xf32> to vector<98x32xf32>
    %5 = arith.addf %2, %4 : vector<98x32xf32>
    %cst_5 = arith.constant 0.000000e+00 : f32
    %6 = vector.broadcast %cst_5 : f32 to vector<98x32xf32>
    %7 = arith.maximumf %5, %6 : vector<98x32xf32>
    %8 = arith.truncf %7 : vector<98x32xf32> to vector<98x32xbf16>
    %c0_6 = arith.constant 0 : index
    %c0_7 = arith.constant 0 : index
    %9 = vector.load %arg4[%c0_6, %c0_7] : memref<98x32xbf16, #tpu.memory_space<vmem>>, vector<98x32xbf16>
    tpu.vector_store %arg4[%c0_6, %c0_7], %8 {strides = array<i32>} : memref<98x32xbf16, #tpu.memory_space<vmem>>, vector<98x32xbf16>,
    return
  }
  func.func @transform_0(%arg0: i32) -> (i32, i32) {
    %c0_i32 = arith.constant 0 : i32
    %c0_i32_0 = arith.constant 0 : i32
    return %arg0, %c0_i32 : i32, i32
  }
  func.func @transform_1(%arg0: i32) -> (i32, i32) {
    %c0_i32 = arith.constant 0 : i32
    %c0_i32_0 = arith.constant 0 : i32
    %c0_i32_1 = arith.constant 0 : i32
    return %c0_i32, %c0_i32_0 : i32, i32
  }
  func.func @transform_2(%arg0: i32) -> (i32, i32) {
    %c0_i32 = arith.constant 0 : i32
    %c0_i32_0 = arith.constant 0 : i32
    %c0_i32_1 = arith.constant 0 : i32
    return %c0_i32, %c0_i32_0 : i32, i32
  }
  func.func @transform_3(%arg0: i32) -> (i32, i32) {
    %c0_i32 = arith.constant 0 : i32
    %c0_i32_0 = arith.constant 0 : i32
    return %arg0, %c0_i32 : i32, i32
  }
}

module attributes {stable_mosaic.version = 11 : i64} {
  func.func @_mm_bias_kernel(%arg0: i32, %arg1: memref<8x512xbf16, #tpu.memory_space<vmem>>, %arg2: memref<512x64xbf16, #tpu.memory_space<vmem>>, %arg3: memref<1x64xf32, #tpu.memory_space<vmem>>, %arg4: memref<8x64xbf16, #tpu.memory_space<vmem>>) attributes {dimension_semantics = [#tpu.dimension_semantics<parallel>], iteration_bounds = array<i64: 1>, scalar_prefetch = 0 : i64, scratch_operands = 0 : i64, tpu.core_type = #tpu.core_type<tc>, window_params = [{transform_indices = @transform_0, window_bounds = array<i64: 8, 512>}, {pipeline_mode = #tpu.pipeline_mode<synchronous>, transform_indices = @transform_1, window_bounds = array<i64: 512, 64>}, {pipeline_mode = #tpu.pipeline_mode<synchronous>, transform_indices = @transform_2, window_bounds = array<i64: 1, 64>}, {transform_indices = @transform_3, window_bounds = array<i64: 8, 64>}]} {
    %c0 = arith.constant 0 : index
    %c0_0 = arith.constant 0 : index
    %0 = vector.load %arg1[%c0, %c0_0] : memref<8x512xbf16, #tpu.memory_space<vmem>>, vector<8x512xbf16>
    %c0_1 = arith.constant 0 : index
    %c0_2 = arith.constant 0 : index
    %1 = vector.load %arg2[%c0_1, %c0_2] : memref<512x64xbf16, #tpu.memory_space<vmem>>, vector<512x64xbf16>
    %cst = arith.constant dense<0.000000e+00> : vector<8x64xf32>
    %2 = tpu.matmul %0, %1, %cst {dimension_numbers = #tpu.dot_dimension_numbers<[1], [0], [0], [1], [0, 0, 1, 1], [], []>} : vector<8x512xbf16>, vector<512x64xbf16>, vector<8x64xf32> -> vector<8x64xf32>
    %c0_3 = arith.constant 0 : index
    %c0_4 = arith.constant 0 : index
    %3 = vector.load %arg3[%c0_3, %c0_4] : memref<1x64xf32, #tpu.memory_space<vmem>>, vector<1x64xf32>
    %4 = vector.broadcast %3 : vector<1x64xf32> to vector<8x64xf32>
    %5 = arith.addf %2, %4 : vector<8x64xf32>
    %cst_5 = arith.constant 0.000000e+00 : f32
    %6 = vector.broadcast %cst_5 : f32 to vector<8x64xf32>
    %7 = arith.maximumf %5, %6 : vector<8x64xf32>
    %8 = arith.truncf %7 : vector<8x64xf32> to vector<8x64xbf16>
    %c0_6 = arith.constant 0 : index
    %c0_7 = arith.constant 0 : index
    %9 = vector.load %arg4[%c0_6, %c0_7] : memref<8x64xbf16, #tpu.memory_space<vmem>>, vector<8x64xbf16>
    tpu.vector_store %arg4[%c0_6, %c0_7], %8 {strides = array<i32>} : memref<8x64xbf16, #tpu.memory_space<vmem>>, vector<8x64xbf16>,
    return
  }
  func.func @transform_0(%arg0: i32) -> (i32, i32) {
    %c0_i32 = arith.constant 0 : i32
    %c0_i32_0 = arith.constant 0 : i32
    return %arg0, %c0_i32 : i32, i32
  }
  func.func @transform_1(%arg0: i32) -> (i32, i32) {
    %c0_i32 = arith.constant 0 : i32
    %c0_i32_0 = arith.constant 0 : i32
    %c0_i32_1 = arith.constant 0 : i32
    return %c0_i32, %c0_i32_0 : i32, i32
  }
  func.func @transform_2(%arg0: i32) -> (i32, i32) {
    %c0_i32 = arith.constant 0 : i32
    %c0_i32_0 = arith.constant 0 : i32
    %c0_i32_1 = arith.constant 0 : i32
    return %c0_i32, %c0_i32_0 : i32, i32
  }
  func.func @transform_3(%arg0: i32) -> (i32, i32) {
    %c0_i32 = arith.constant 0 : i32
    %c0_i32_0 = arith.constant 0 : i32
    return %arg0, %c0_i32 : i32, i32
  }
}

module attributes {stable_mosaic.version = 11 : i64} {
  func.func @_fused_fc_kernel(%arg0: i32, %arg1: memref<2x256xbf16, #tpu.memory_space<vmem>>, %arg2: memref<256x512xbf16, #tpu.memory_space<vmem>>, %arg3: memref<1x512xf32, #tpu.memory_space<vmem>>, %arg4: memref<512x6xbf16, #tpu.memory_space<vmem>>, %arg5: memref<1x6xf32, #tpu.memory_space<vmem>>, %arg6: memref<2x6xf32, #tpu.memory_space<vmem>>) attributes {dimension_semantics = [#tpu.dimension_semantics<parallel>], iteration_bounds = array<i64: 1>, scalar_prefetch = 0 : i64, scratch_operands = 0 : i64, tpu.core_type = #tpu.core_type<tc>, window_params = [{transform_indices = @transform_0, window_bounds = array<i64: 2, 256>}, {pipeline_mode = #tpu.pipeline_mode<synchronous>, transform_indices = @transform_1, window_bounds = array<i64: 256, 512>}, {pipeline_mode = #tpu.pipeline_mode<synchronous>, transform_indices = @transform_2, window_bounds = array<i64: 1, 512>}, {pipeline_mode = #tpu.pipeline_mode<synchronous>, transform_indices = @transform_3, window_bounds = array<i64: 512, 6>}, {pipeline_mode = #tpu.pipeline_mode<synchronous>, transform_indices = @transform_4, window_bounds = array<i64: 1, 6>}, {transform_indices = @transform_5, window_bounds = array<i64: 2, 6>}]} {
    %c0 = arith.constant 0 : index
    %c0_0 = arith.constant 0 : index
    %0 = vector.load %arg1[%c0, %c0_0] : memref<2x256xbf16, #tpu.memory_space<vmem>>, vector<2x256xbf16>
    %c0_1 = arith.constant 0 : index
    %c0_2 = arith.constant 0 : index
    %1 = vector.load %arg2[%c0_1, %c0_2] : memref<256x512xbf16, #tpu.memory_space<vmem>>, vector<256x512xbf16>
    %cst = arith.constant dense<0.000000e+00> : vector<2x512xf32>
    %2 = tpu.matmul %0, %1, %cst {dimension_numbers = #tpu.dot_dimension_numbers<[1], [0], [0], [1], [0, 0, 1, 1], [], []>} : vector<2x256xbf16>, vector<256x512xbf16>, vector<2x512xf32> -> vector<2x512xf32>
    %c0_3 = arith.constant 0 : index
    %c0_4 = arith.constant 0 : index
    %3 = vector.load %arg3[%c0_3, %c0_4] : memref<1x512xf32, #tpu.memory_space<vmem>>, vector<1x512xf32>
    %4 = vector.broadcast %3 : vector<1x512xf32> to vector<2x512xf32>
    %5 = arith.addf %2, %4 : vector<2x512xf32>
    %cst_5 = arith.constant 0.000000e+00 : f32
    %6 = vector.broadcast %cst_5 : f32 to vector<2x512xf32>
    %7 = arith.maximumf %5, %6 : vector<2x512xf32>
    %8 = arith.truncf %7 : vector<2x512xf32> to vector<2x512xbf16>
    %c0_6 = arith.constant 0 : index
    %c0_7 = arith.constant 0 : index
    %9 = vector.load %arg4[%c0_6, %c0_7] : memref<512x6xbf16, #tpu.memory_space<vmem>>, vector<512x6xbf16>
    %cst_8 = arith.constant dense<0.000000e+00> : vector<2x6xf32>
    %10 = tpu.matmul %8, %9, %cst_8 {dimension_numbers = #tpu.dot_dimension_numbers<[1], [0], [0], [1], [0, 0, 1, 1], [], []>} : vector<2x512xbf16>, vector<512x6xbf16>, vector<2x6xf32> -> vector<2x6xf32>
    %c0_9 = arith.constant 0 : index
    %c0_10 = arith.constant 0 : index
    %11 = vector.load %arg5[%c0_9, %c0_10] : memref<1x6xf32, #tpu.memory_space<vmem>>, vector<1x6xf32>
    %12 = vector.broadcast %11 : vector<1x6xf32> to vector<2x6xf32>
    %13 = arith.addf %10, %12 : vector<2x6xf32>
    %c0_11 = arith.constant 0 : index
    %c0_12 = arith.constant 0 : index
    %14 = vector.load %arg6[%c0_11, %c0_12] : memref<2x6xf32, #tpu.memory_space<vmem>>, vector<2x6xf32>
    tpu.vector_store %arg6[%c0_11, %c0_12], %13 {strides = array<i32>} : memref<2x6xf32, #tpu.memory_space<vmem>>, vector<2x6xf32>,
    return
  }
  func.func @transform_0(%arg0: i32) -> (i32, i32) {
    %c0_i32 = arith.constant 0 : i32
    %c0_i32_0 = arith.constant 0 : i32
    return %arg0, %c0_i32 : i32, i32
  }
  func.func @transform_1(%arg0: i32) -> (i32, i32) {
    %c0_i32 = arith.constant 0 : i32
    %c0_i32_0 = arith.constant 0 : i32
    %c0_i32_1 = arith.constant 0 : i32
    return %c0_i32, %c0_i32_0 : i32, i32
  }
  func.func @transform_2(%arg0: i32) -> (i32, i32) {
    %c0_i32 = arith.constant 0 : i32
    %c0_i32_0 = arith.constant 0 : i32
    %c0_i32_1 = arith.constant 0 : i32
    return %c0_i32, %c0_i32_0 : i32, i32
  }
  func.func @transform_3(%arg0: i32) -> (i32, i32) {
    %c0_i32 = arith.constant 0 : i32
    %c0_i32_0 = arith.constant 0 : i32
    %c0_i32_1 = arith.constant 0 : i32
    return %c0_i32, %c0_i32_0 : i32, i32
  }
  func.func @transform_4(%arg0: i32) -> (i32, i32) {
    %c0_i32 = arith.constant 0 : i32
    %c0_i32_0 = arith.constant 0 : i32
    %c0_i32_1 = arith.constant 0 : i32
    return %c0_i32, %c0_i32_0 : i32, i32
  }
  func.func @transform_5(%arg0: i32) -> (i32, i32) {
    %c0_i32 = arith.constant 0 : i32
    %c0_i32_0 = arith.constant 0 : i32
    return %arg0, %c0_i32 : i32, i32
  }
}

</mosaic_0001>

<bundles_post_ra>
// kernel: dqn_forward.3
= control target key start
LH: loop header
LB: loop body
LE: loop exit
PB: predicated region body
PF: predicated region fallthrough
CT: control target
= control target key end

     0   :  { %vm338_vm0 = vcmask 257024   ;;  %vm351_vm1 = vcmask 253952   ;;  %s732_s1 = inlined_call_operand.vmem [shape: bf16[256,32], index: 1, kind: input, shape index: {}]   ;;  %s733_s2 = inlined_call_operand.vmem [shape: f32[1,32], index: 2, kind: input, shape index: {}]   ;;  %s734_s0 = inlined_call_operand.vmem [shape: bf16[98,256], index: 0, kind: input, shape index: {}]   ;;  %s735_s3 = inlined_call_operand.vmem [shape: bf16[98,32], index: 3, kind: output, shape index: {}]  }
   0x1   :  { %v488_v0 = vld [vmem:[%s732_s1 + $0x38] sm:$0xff]  ;;  %v487_v2 = vld [vmem:[%s732_s1 + $0x30] sm:$0xff]  ;;  %v486_v4 = vld [vmem:[%s732_s1 + $0x28] sm:$0xff] }
   0x2   :  { %v496_v1 = vld [vmem:[%s732_s1 + $0x78] sm:$0xff]  ;;  %226 = vmatpush.bf16.msra.mxu0 %v488_v0  ;;  %497 = vmatpush.bf16.msra.mxu2 %v488_v0  ;;  %v495_v3 = vld [vmem:[%s732_s1 + $0x70] sm:$0xff]  ;;  %v494_v5 = vld [vmem:[%s732_s1 + $0x68] sm:$0xff] }
   0x3   :  { %269 = vmatpush.bf16.msra.mxu1 %v496_v1  ;;  %505 = vmatpush.bf16.msra.mxu3 %v496_v1  ;;  %v485_v6 = vld [vmem:[%s732_s1 + $0x20] sm:$0xff]  ;;  %v484_v8 = vld [vmem:[%s732_s1 + $0x18] sm:$0xff]  ;;  %v483_v10 = vld [vmem:[%s732_s1 + $0x10] sm:$0xff] }
   0x4   :  { %v493_v7 = vld [vmem:[%s732_s1 + $0x60] sm:$0xff]  ;;  %v492_v9 = vld [vmem:[%s732_s1 + $0x58] sm:$0xff]  ;;  %v491_v11 = vld [vmem:[%s732_s1 + $0x50] sm:$0xff] }
   0x5   :  { %v482_v12 = vld [vmem:[%s732_s1 + $0x8] sm:$0xff]  ;;  %v481_v14 = vld [vmem:[%s732_s1] sm:$0xff]  ;;  %v383_v18 = vld [vmem:[%s734_s0 + $0x30] sm:$0xf] }
   0x6   :  { %227 = vmatpush.bf16.msra.mxu0 %v487_v2  ;;  %498 = vmatpush.bf16.msra.mxu2 %v487_v2  ;;  %v490_v13 = vld [vmem:[%s732_s1 + $0x48] sm:$0xff]  ;;  %v489_v15 = vld [vmem:[%s732_s1 + $0x40] sm:$0xff]  ;;  %v476_v19 = vld [vmem:[%s734_s0 + $0x34] sm:$0xf0] }
   0x7   :  { %270 = vmatpush.bf16.msra.mxu1 %v495_v3  ;;  %506 = vmatpush.bf16.msra.mxu3 %v495_v3  ;;  %v359_v16 = vld [vmem:[%s734_s0] sm:$0xf]  ;;  %v470_v17 = vld [vmem:[%s734_s0 + $0x4] sm:$0xf0]  ;;  %v469_v20 = vld [vmem:[%s734_s0 + $0x4] sm:$0xf]  ;;  %v384_v25 = vor.u32 %v476_v19, %v383_v18 }
   0x8   :  { %v361_v21 = vld [vmem:[%s734_s0 + $0x8] sm:$0xf0]  ;;  %v477_v22 = vld [vmem:[%s734_s0 + $0x44] sm:$0xf]  ;;  %v360_v24 = vor.u32 %v470_v17, %v359_v16  ;;  %v367_v28 = vld [vmem:[%s734_s0 + $0x10] sm:$0xf] }
   0x9   :  { %v393_v23 = vld [vmem:[%s734_s0 + $0x48] sm:$0xf0]  ;;  %v364_v26 = vor.u32 %v469_v20, %v361_v21  ;;  %v472_v29 = vld [vmem:[%s734_s0 + $0x14] sm:$0xf0]  ;;  %v391_v30 = vld [vmem:[%s734_s0 + $0x40] sm:$0xf] }
   0xa   :  { %228 = vmatpush.bf16.msra.mxu0 %v486_v4  ;;  %499 = vmatpush.bf16.msra.mxu2 %v486_v4  ;;  %v396_v27 = vor.u32 %v477_v22, %v393_v23  ;;  %v478_v31 = vld [vmem:[%s734_s0 + $0x44] sm:$0xf0]  ;;  %v471_v32 = vld [vmem:[%s734_s0 + $0x14] sm:$0xf]  ;;  %v369_v33 = vld [vmem:[%s734_s0 + $0x18] sm:$0xf0]  ;;  %v368_v36 = vor.u32 %v472_v29, %v367_v28 }
   0xb   :  { %271 = vmatpush.bf16.msra.mxu1 %v494_v5  ;;  %507 = vmatpush.bf16.msra.mxu3 %v494_v5  ;;  %v479_v34 = vld [vmem:[%s734_s0 + $0x54] sm:$0xf]  ;;  %v401_v35 = vld [vmem:[%s734_s0 + $0x58] sm:$0xf0]  ;;  %v392_v37 = vor.u32 %v478_v31, %v391_v30  ;;  %v372_v38 = vor.u32 %v471_v32, %v369_v33  ;;  %v26_v40 = vld [vmem:[%s734_s0 + $0x60] sm:$0x11] }
   0xc   :  { %v404_v39 = vor.u32 %v479_v34, %v401_v35  ;;  %v375_v41 = vld [vmem:[%s734_s0 + $0x20] sm:$0xf]  ;;  %v474_v42 = vld [vmem:[%s734_s0 + $0x24] sm:$0xf0]  ;;  %v399_v43 = vld [vmem:[%s734_s0 + $0x50] sm:$0xf]  ;;  %v101_v45 = vunpack.c.h.b16 %v26_v40  ;;  %v100_v52 = vunpack.c.l.b16 %v26_v40 }
   0xd   :  { %v480_v44 = vld [vmem:[%s734_s0 + $0x54] sm:$0xf0]  ;;  %v473_v46 = vld [vmem:[%s734_s0 + $0x24] sm:$0xf]  ;;  %v377_v47 = vld [vmem:[%s734_s0 + $0x28] sm:$0xf0]  ;;  %v376_v48 = vor.u32 %v474_v42, %v375_v41 }
   0xe   :  { %229 = vmatpush.bf16.msra.mxu0 %v485_v6  ;;  %500 = vmatpush.bf16.msra.mxu2 %v485_v6  ;;  %v400_v49 = vor.u32 %v480_v44, %v399_v43  ;;  %v380_v50 = vor.u32 %v473_v46, %v377_v47  ;;  %v115_v51 = vpack.c.b16 %v101_v45, %v101_v45  ;;  %v475_v53 = vld [vmem:[%s734_s0 + $0x34] sm:$0xf]  ;;  %v385_v54 = vld [vmem:[%s734_s0 + $0x38] sm:$0xf0]  ;;  %v660_v57 = vld [vmem:[%s733_s2] ss:$0 sm:$0xff] }
   0xf   :  { %272 = vmatpush.bf16.msra.mxu1 %v493_v7  ;;  %508 = vmatpush.bf16.msra.mxu3 %v493_v7  ;;  %v114_v55 = vpack.c.b16 %v100_v52, %v100_v52  ;;  %v388_v56 = vor.u32 %v475_v53, %v385_v54 }
  0x12   :  { %230 = vmatpush.bf16.msra.mxu0 %v484_v8  ;;  %501 = vmatpush.bf16.msra.mxu2 %v484_v8 }
  0x13   :  { %273 = vmatpush.bf16.msra.mxu1 %v492_v9  ;;  %509 = vmatpush.bf16.msra.mxu3 %v492_v9 }
  0x16   :  { %231 = vmatpush.bf16.msra.mxu0 %v483_v10  ;;  %502 = vmatpush.bf16.msra.mxu2 %v483_v10 }
  0x17   :  { %274 = vmatpush.bf16.msra.mxu1 %v491_v11  ;;  %510 = vmatpush.bf16.msra.mxu3 %v491_v11 }
  0x1a   :  { %232 = vmatpush.bf16.msra.mxu0 %v482_v12  ;;  %503 = vmatpush.bf16.msra.mxu2 %v482_v12 }
  0x1b   :  { %275 = vmatpush.bf16.msra.mxu1 %v490_v13  ;;  %511 = vmatpush.bf16.msra.mxu3 %v490_v13 }
  0x1e   :  { %233 = vmatpush.bf16.msra.mxu0 %v481_v14  ;;  %504 = vmatpush.bf16.msra.mxu2 %v481_v14 }
  0x1f   :  { %276 = vmatpush.bf16.msra.mxu1 %v489_v15  ;;  %512 = vmatpush.bf16.msra.mxu3 %v489_v15 }
  0x21   :  { %234 = vmatmul.bf16.vlgmr.msra.gmra.mxu0 %v360_v24  ;;  %249 = vmatmul.bf16.vlgmr.msra.gmra.mxu2 %v384_v25 }
  0x22   :  { %277 = vmatmul.bf16.vlgmr.msra.gmra.mxu1 %v364_v26  ;;  %297 = vmatmul.bf16.vlgmr.msra.gmra.mxu3 %v396_v27 }
  0x31   :  { %239 = vmatmul.bf16.gmra.mxu0 %v368_v36  ;;  %254 = vmatmul.bf16.gmra.mxu2 %v392_v37 }
  0x32   :  { %282 = vmatmul.bf16.gmra.mxu1 %v372_v38  ;;  %302 = vmatmul.bf16.gmra.mxu3 %v404_v39 }
  0x41   :  { %244 = vmatmul.bf16.gmra.mxu0 %v376_v48  ;;  %259 = vmatmul.bf16.gmra.mxu2 %v400_v49 }
  0x42   :  { %287 = vmatmul.bf16.gmra.mxu1 %v380_v50  ;;  %307 = vmatmul.bf16.gmra.mxu3 %v115_v51 }
  0x51   :  { %264 = vmatmul.bf16.gmra.mxu2 %v114_v55 }
  0x52   :  { %292 = vmatmul.bf16.gmra.mxu1 %v388_v56 }
  0x9e   :  { %v235_v58 = vpop.f32.mrf.mxu0 }
  0x9f   :  { %v236_v59 = vadd.f32 %v660_v57, %v235_v58  ;;  %v278_v60 = vpop.f32.mrf.mxu1 }
  0xa1   :  { %v279_v61 = vadd.f32 %v278_v60, %v236_v59 }
  0xa3   :  { %v312_v62 = vmax.f32 %v279_v61, 0.0 }
  0xa4   :  { %v663_v63 = vpop.f32.mrf.mxu2 }
  0xa5   :  { %v325_v0 = vpack.c.bf16 %v312_v62, %v312_v62  ;;  %v298_v1 = vpop.f32.mrf.mxu3  ;;  %v251_v55 = vadd.f32 %v660_v57, %v663_v63 }
  0xa6   :  { %v237_v2 = vpop.f32.mrf.mxu0 }
  0xa7   :  { %339 = vst.msk [vmem:[%s735_s3] sm:$0xf] %vm338_vm0, %v325_v0  ;;  %v238_v3 = vadd.f32 %v660_v57, %v237_v2  ;;  %v280_v4 = vpop.f32.mrf.mxu1 }
  0xa9   :  { %v281_v5 = vadd.f32 %v280_v4, %v238_v3 }
  0xab   :  { %v313_v6 = vmax.f32 %v281_v5, 0.0 }
  0xac   :  { %v670_v7 = vpop.f32.mrf.mxu2 }
  0xad   :  { %v326_v8 = vpack.c.bf16 %v313_v6, %v313_v6  ;;  %v300_v9 = vpop.f32.mrf.mxu3  ;;  %v253_v2 = vadd.f32 %v660_v57, %v670_v7 }
  0xae   :  { %v240_v10 = vpop.f32.mrf.mxu0 }
  0xaf   :  { %340 = vst.msk [vmem:[%s735_s3 + $0x4] sm:$0xf] %vm338_vm0, %v326_v8  ;;  %v241_v11 = vadd.f32 %v660_v57, %v240_v10  ;;  %v283_v12 = vpop.f32.mrf.mxu1 }
  0xb1   :  { %v284_v13 = vadd.f32 %v283_v12, %v241_v11 }
  0xb3   :  { %v314_v14 = vmax.f32 %v284_v13, 0.0 }
  0xb4   :  { %v255_v15 = vpop.f32.mrf.mxu2 }
  0xb5   :  { %v327_v16 = vpack.c.bf16 %v314_v14, %v314_v14  ;;  %v256_v17 = vadd.f32 %v660_v57, %v255_v15  ;;  %v303_v18 = vpop.f32.mrf.mxu3 }
  0xb6   :  { %v242_v19 = vpop.f32.mrf.mxu0 }
  0xb7   :  { %341 = vst.msk [vmem:[%s735_s3 + $0x8] sm:$0xf] %vm338_vm0, %v327_v16  ;;  %v299_v20 = vadd.f32 %v298_v1, %v256_v17  ;;  %v243_v21 = vadd.f32 %v660_v57, %v242_v19  ;;  %v285_v22 = vpop.f32.mrf.mxu1 }
  0xb9   :  { %v320_v23 = vmax.f32 %v299_v20, 0.0  ;;  %v286_v24 = vadd.f32 %v285_v22, %v243_v21 }
  0xbb   :  { %v333_v25 = vpack.c.bf16 %v320_v23, %v320_v23  ;;  %v315_v26 = vmax.f32 %v286_v24, 0.0 }
  0xbc   :  { %v257_v27 = vpop.f32.mrf.mxu2 }
  0xbd   :  { %347 = vst.msk [vmem:[%s735_s3 + $0x20] sm:$0xf] %vm338_vm0, %v333_v25  ;;  %v328_v28 = vpack.c.bf16 %v315_v26, %v315_v26  ;;  %v258_v29 = vadd.f32 %v660_v57, %v257_v27  ;;  %v305_v30 = vpop.f32.mrf.mxu3 }
  0xbe   :  { %v245_v31 = vpop.f32.mrf.mxu0 }
  0xbf   :  { %342 = vst.msk [vmem:[%s735_s3 + $0xc] sm:$0xf] %vm338_vm0, %v328_v28  ;;  %v301_v32 = vadd.f32 %v300_v9, %v258_v29  ;;  %v246_v33 = vadd.f32 %v660_v57, %v245_v31  ;;  %v288_v34 = vpop.f32.mrf.mxu1 }
  0xc1   :  { %v321_v35 = vmax.f32 %v301_v32, 0.0  ;;  %v289_v36 = vadd.f32 %v288_v34, %v246_v33 }
  0xc3   :  { %v334_v37 = vpack.c.bf16 %v321_v35, %v321_v35  ;;  %v316_v38 = vmax.f32 %v289_v36, 0.0 }
  0xc4   :  { %v260_v39 = vpop.f32.mrf.mxu2 }
  0xc5   :  { %348 = vst.msk [vmem:[%s735_s3 + $0x24] sm:$0xf] %vm338_vm0, %v334_v37  ;;  %v329_v40 = vpack.c.bf16 %v316_v38, %v316_v38  ;;  %v261_v41 = vadd.f32 %v660_v57, %v260_v39  ;;  %v308_v42 = vpop.f32.mrf.mxu3 }
  0xc6   :  { %v247_v43 = vpop.f32.mrf.mxu0 }
  0xc7   :  { %343 = vst.msk [vmem:[%s735_s3 + $0x10] sm:$0xf] %vm338_vm0, %v329_v40  ;;  %v304_v44 = vadd.f32 %v303_v18, %v261_v41  ;;  %v248_v45 = vadd.f32 %v660_v57, %v247_v43  ;;  %v290_v46 = vpop.f32.mrf.mxu1 }
  0xc9   :  { %v322_v47 = vmax.f32 %v304_v44, 0.0  ;;  %v291_v48 = vadd.f32 %v290_v46, %v248_v45 }
  0xcb   :  { %v335_v49 = vpack.c.bf16 %v322_v47, %v322_v47  ;;  %v317_v50 = vmax.f32 %v291_v48, 0.0 }
  0xcc   :  { %v262_v51 = vpop.f32.mrf.mxu2 }
  0xcd   :  { %349 = vst.msk [vmem:[%s735_s3 + $0x28] sm:$0xf] %vm338_vm0, %v335_v49  ;;  %v330_v52 = vpack.c.bf16 %v317_v50, %v317_v50  ;;  %v263_v53 = vadd.f32 %v660_v57, %v262_v51  ;;  %v310_v54 = vpop.f32.mrf.mxu3 }
  0xcf   :  { %344 = vst.msk [vmem:[%s735_s3 + $0x14] sm:$0xf] %vm338_vm0, %v330_v52  ;;  %v306_v56 = vadd.f32 %v305_v30, %v263_v53  ;;  %v293_v58 = vpop.f32.mrf.mxu1 }
  0xd0   :  { %v294_v59 = vadd.f32 %v293_v58, %v251_v55 }
  0xd1   :  { %v323_v60 = vmax.f32 %v306_v56, 0.0 }
  0xd2   :  { %v318_v61 = vmax.f32 %v294_v59, 0.0 }
  0xd3   :  { %v336_v62 = vpack.c.bf16 %v323_v60, %v323_v60 }
  0xd4   :  { %v331_v0 = vpack.c.bf16 %v318_v61, %v318_v61  ;;  %v265_v1 = vpop.f32.mrf.mxu2 }
  0xd5   :  { %350 = vst.msk [vmem:[%s735_s3 + $0x2c] sm:$0xf] %vm338_vm0, %v336_v62  ;;  %v266_v63 = vadd.f32 %v660_v57, %v265_v1 }
  0xd6   :  { %345 = vst.msk [vmem:[%s735_s3 + $0x18] sm:$0xf] %vm338_vm0, %v331_v0 }
  0xd7   :  { %v309_v3 = vadd.f32 %v308_v42, %v266_v63  ;;  %v295_v4 = vpop.f32.mrf.mxu1 }
  0xd8   :  { %v296_v5 = vadd.f32 %v295_v4, %v253_v2 }
  0xd9   :  { %v324_v6 = vmax.f32 %v309_v3, 0.0 }
  0xda   :  { %v319_v8 = vmax.f32 %v296_v5, 0.0 }
  0xdb   :  { %v337_v9 = vpack.c.bf16 %v324_v6, %v324_v6 }
  0xdc   :  { %v332_v10 = vpack.c.bf16 %v319_v8, %v319_v8  ;;  %v267_v11 = vpop.f32.mrf.mxu2 }
  0xdd   :  { %352 = vst.msk [vmem:[%s735_s3 + $0x30] sm:$0x1] %vm351_vm1, %v337_v9 }
  0xde   :  { %346 = vst.msk [vmem:[%s735_s3 + $0x1c] sm:$0xf] %vm338_vm0, %v332_v10 }

// kernel: dqn_forward.4
= control target key start
LH: loop header
LB: loop body
LE: loop exit
PB: predicated region body
PF: predicated region fallthrough
CT: control target
= control target key end

     0   :  { %vm344_vm0 = vcmask 519168   ;;  %s639_s1 = inlined_call_operand.vmem [shape: bf16[512,64], index: 1, kind: input, shape index: {}]   ;;  %s640_s2 = inlined_call_operand.vmem [shape: f32[1,64], index: 2, kind: input, shape index: {}]   ;;  %s641_s0 = inlined_call_operand.vmem [shape: bf16[8,512], index: 0, kind: input, shape index: {}]   ;;  %s642_s3 = inlined_call_operand.vmem [shape: bf16[8,64], index: 3, kind: output, shape index: {}]  }
   0x1   :  { %v485_v0 = vld [vmem:[%s639_s1 + $0x38] sm:$0xff]  ;;  %v484_v4 = vld [vmem:[%s639_s1 + $0x30] sm:$0xff]  ;;  %v483_v8 = vld [vmem:[%s639_s1 + $0x28] sm:$0xff] }
   0x2   :  { %v493_v1 = vld [vmem:[%s639_s1 + $0x78] sm:$0xff]  ;;  %290 = vmatpush.bf16.msra.mxu0 %v485_v0  ;;  %v492_v5 = vld [vmem:[%s639_s1 + $0x70] sm:$0xff]  ;;  %v491_v9 = vld [vmem:[%s639_s1 + $0x68] sm:$0xff] }
   0x3   :  { %v501_v2 = vld [vmem:[%s639_s1 + $0xb8] sm:$0xff]  ;;  %303 = vmatpush.bf16.msra.mxu1 %v493_v1  ;;  %v500_v6 = vld [vmem:[%s639_s1 + $0xb0] sm:$0xff]  ;;  %v499_v10 = vld [vmem:[%s639_s1 + $0xa8] sm:$0xff] }
   0x4   :  { %v509_v3 = vld [vmem:[%s639_s1 + $0xf8] sm:$0xff]  ;;  %316 = vmatpush.bf16.msra.mxu2 %v501_v2  ;;  %v508_v7 = vld [vmem:[%s639_s1 + $0xf0] sm:$0xff]  ;;  %v507_v11 = vld [vmem:[%s639_s1 + $0xe8] sm:$0xff] }
   0x5   :  { %329 = vmatpush.bf16.msra.mxu3 %v509_v3  ;;  %v482_v12 = vld [vmem:[%s639_s1 + $0x20] sm:$0xff]  ;;  %v481_v16 = vld [vmem:[%s639_s1 + $0x18] sm:$0xff]  ;;  %v480_v20 = vld [vmem:[%s639_s1 + $0x10] sm:$0xff] }
   0x6   :  { %291 = vmatpush.bf16.msra.mxu0 %v484_v4  ;;  %v490_v13 = vld [vmem:[%s639_s1 + $0x60] sm:$0xff]  ;;  %v489_v17 = vld [vmem:[%s639_s1 + $0x58] sm:$0xff]  ;;  %v488_v21 = vld [vmem:[%s639_s1 + $0x50] sm:$0xff] }
   0x7   :  { %304 = vmatpush.bf16.msra.mxu1 %v492_v5  ;;  %v498_v14 = vld [vmem:[%s639_s1 + $0xa0] sm:$0xff]  ;;  %v497_v18 = vld [vmem:[%s639_s1 + $0x98] sm:$0xff]  ;;  %v496_v22 = vld [vmem:[%s639_s1 + $0x90] sm:$0xff] }
   0x8   :  { %317 = vmatpush.bf16.msra.mxu2 %v500_v6  ;;  %v506_v15 = vld [vmem:[%s639_s1 + $0xe0] sm:$0xff]  ;;  %v505_v19 = vld [vmem:[%s639_s1 + $0xd8] sm:$0xff]  ;;  %v504_v23 = vld [vmem:[%s639_s1 + $0xd0] sm:$0xff] }
   0x9   :  { %330 = vmatpush.bf16.msra.mxu3 %v508_v7  ;;  %v479_v24 = vld [vmem:[%s639_s1 + $0x8] sm:$0xff]  ;;  %v14_v26 = vld [vmem:[%s641_s0] sm:$0xff] }
   0xa   :  { %292 = vmatpush.bf16.msra.mxu0 %v483_v8  ;;  %v487_v25 = vld [vmem:[%s639_s1 + $0x48] sm:$0xff]  ;;  %v86_v30 = vunpack.c.l.b16 %v14_v26  ;;  %v87_v31 = vunpack.c.h.b16 %v14_v26  ;;  %v478_v32 = vld [vmem:[%s639_s1] sm:$0xff] }
   0xb   :  { %305 = vmatpush.bf16.msra.mxu1 %v491_v9  ;;  %v495_v27 = vld [vmem:[%s639_s1 + $0x88] sm:$0xff]  ;;  %v486_v33 = vld [vmem:[%s639_s1 + $0x40] sm:$0xff] }
   0xc   :  { %318 = vmatpush.bf16.msra.mxu2 %v499_v10  ;;  %v503_v28 = vld [vmem:[%s639_s1 + $0xc8] sm:$0xff]  ;;  %v494_v36 = vld [vmem:[%s639_s1 + $0x80] sm:$0xff]  ;;  %v90_v38 = vpack.c.b16 %v86_v30, %v86_v30  ;;  %v91_v39 = vpack.c.b16 %v87_v31, %v87_v31 }
   0xd   :  { %331 = vmatpush.bf16.msra.mxu3 %v507_v11  ;;  %v15_v29 = vld [vmem:[%s641_s0 + $0x8] sm:$0xff]  ;;  %v502_v37 = vld [vmem:[%s639_s1 + $0xc0] sm:$0xff] }
   0xe   :  { %293 = vmatpush.bf16.msra.mxu0 %v482_v12  ;;  %v88_v34 = vunpack.c.l.b16 %v15_v29  ;;  %v89_v35 = vunpack.c.h.b16 %v15_v29  ;;  %v510_v42 = vld [vmem:[%s640_s2] ss:$0 sm:$0xff] }
   0xf   :  { %306 = vmatpush.bf16.msra.mxu1 %v490_v13 }
  0x10   :  { %319 = vmatpush.bf16.msra.mxu2 %v498_v14  ;;  %v92_v40 = vpack.c.b16 %v88_v34, %v88_v34  ;;  %v93_v41 = vpack.c.b16 %v89_v35, %v89_v35 }
  0x11   :  { %332 = vmatpush.bf16.msra.mxu3 %v506_v15 }
  0x12   :  { %294 = vmatpush.bf16.msra.mxu0 %v481_v16 }
  0x13   :  { %307 = vmatpush.bf16.msra.mxu1 %v489_v17 }
  0x14   :  { %320 = vmatpush.bf16.msra.mxu2 %v497_v18 }
  0x15   :  { %333 = vmatpush.bf16.msra.mxu3 %v505_v19 }
  0x16   :  { %295 = vmatpush.bf16.msra.mxu0 %v480_v20 }
  0x17   :  { %308 = vmatpush.bf16.msra.mxu1 %v488_v21 }
  0x18   :  { %321 = vmatpush.bf16.msra.mxu2 %v496_v22 }
  0x19   :  { %334 = vmatpush.bf16.msra.mxu3 %v504_v23 }
  0x1a   :  { %296 = vmatpush.bf16.msra.mxu0 %v479_v24 }
  0x1b   :  { %309 = vmatpush.bf16.msra.mxu1 %v487_v25 }
  0x1c   :  { %322 = vmatpush.bf16.msra.mxu2 %v495_v27 }
  0x1d   :  { %335 = vmatpush.bf16.msra.mxu3 %v503_v28 }
  0x1e   :  { %297 = vmatpush.bf16.msra.mxu0 %v478_v32 }
  0x1f   :  { %310 = vmatpush.bf16.msra.mxu1 %v486_v33 }
  0x20   :  { %323 = vmatpush.bf16.msra.mxu2 %v494_v36 }
  0x21   :  { %336 = vmatpush.bf16.msra.mxu3 %v502_v37  ;;  %298 = vmatmul.bf16.vlgmr.msra.gmra.mxu0 %v90_v38 }
  0x22   :  { %311 = vmatmul.bf16.vlgmr.msra.gmra.mxu1 %v91_v39 }
  0x23   :  { %324 = vmatmul.bf16.vlgmr.msra.gmra.mxu2 %v92_v40 }
  0x24   :  { %337 = vmatmul.bf16.vlgmr.msra.gmra.mxu3 %v93_v41 }
  0x9e   :  { %v299_v43 = vpop.f32.mrf.mxu0 }
  0x9f   :  { %v312_v44 = vpop.f32.mrf.mxu1  ;;  %v300_v45 = vadd.f32 %v510_v42, %v299_v43 }
  0xa1   :  { %v313_v46 = vadd.f32 %v312_v44, %v300_v45 }
  0xa6   :  { %v325_v47 = vpop.f32.mrf.mxu2  ;;  %v301_v50 = vpop.f32.mrf.mxu0 }
  0xa7   :  { %v338_v48 = vpop.f32.mrf.mxu3  ;;  %v326_v49 = vadd.f32 %v325_v47, %v313_v46  ;;  %v314_v51 = vpop.f32.mrf.mxu1 }
  0xa9   :  { %v339_v52 = vadd.f32 %v338_v48, %v326_v49 }
  0xab   :  { %v342_v53 = vmax.f32 %v339_v52, 0.0 }
  0xad   :  { %v343_v54 = vpack.c.bf16 %v342_v53, %v342_v53 }
  0xae   :  { %v327_v55 = vpop.f32.mrf.mxu2 }
  0xaf   :  { %v340_v56 = vpop.f32.mrf.mxu3  ;;  %345 = vst.msk [vmem:[%s642_s3] sm:$0xf] %vm344_vm0, %v343_v54 }

// kernel: dqn_forward.5
= control target key start
LH: loop header
LB: loop body
LE: loop exit
PB: predicated region body
PF: predicated region fallthrough
CT: control target
= control target key end

     0   :  { %s1907_s0 = inlined_call_operand.vmem [shape: bf16[2,256], index: 0, kind: input, shape index: {}]   ;;  %s1908_s1 = inlined_call_operand.vmem [shape: bf16[256,512], index: 1, kind: input, shape index: {}]   ;;  %s1909_s2 = inlined_call_operand.vmem [shape: f32[1,512], index: 2, kind: input, shape index: {}]   ;;  %s1910_s3 = inlined_call_operand.vmem [shape: bf16[512,6], index: 3, kind: input, shape index: {}]   ;;  %s1911_s4 = inlined_call_operand.vmem [shape: f32[1,6], index: 4, kind: input, shape index: {}]   ;;  %s1912_s5 = inlined_call_operand.hbm [shape: f32[2,6], index: 5, kind: output, shape index: {}]  }
   0x1   :  { %v978_v0 = vld [vmem:[%s1908_s1 + $0xe0] sm:$0xf]  ;;  %v1278_v1 = vld [vmem:[%s1908_s1 + $0xec] sm:$0xf0]  ;;  %v1276_v5 = vld [vmem:[%s1908_s1 + $0xe4] sm:$0xf] }
   0x2   :  { %v1106_v2 = vld [vmem:[%s1908_s1 + $0x1e0] sm:$0xf]  ;;  %v979_v3 = vor.u32 %v1278_v1, %v978_v0  ;;  %v1310_v4 = vld [vmem:[%s1908_s1 + $0x1ec] sm:$0xf0]  ;;  %v980_v6 = vld [vmem:[%s1908_s1 + $0xf0] sm:$0xf0] }
   0x3   :  { %v1107_v7 = vor.u32 %v1310_v4, %v1106_v2  ;;  %v983_v8 = vor.u32 %v1276_v5, %v980_v6  ;;  %v1308_v9 = vld [vmem:[%s1908_s1 + $0x1e4] sm:$0xf]  ;;  %v1108_v10 = vld [vmem:[%s1908_s1 + $0x1f0] sm:$0xf0]  ;;  %v962_v11 = vld [vmem:[%s1908_s1 + $0xc0] sm:$0xf] }
   0x4   :  { %422 = vmatpush.bf16.msra.mxu0 %v979_v3  ;;  %v1111_v12 = vor.u32 %v1308_v9, %v1108_v10  ;;  %v1274_v13 = vld [vmem:[%s1908_s1 + $0xcc] sm:$0xf0]  ;;  %v1090_v14 = vld [vmem:[%s1908_s1 + $0x1c0] sm:$0xf]  ;;  %v1272_v18 = vld [vmem:[%s1908_s1 + $0xc4] sm:$0xf] }
   0x5   :  { %v1306_v15 = vld [vmem:[%s1908_s1 + $0x1cc] sm:$0xf0]  ;;  %435 = vmatpush.bf16.msra.mxu1 %v1107_v7  ;;  %448 = vmatpush.bf16.msra.mxu2 %v983_v8  ;;  %v963_v16 = vor.u32 %v1274_v13, %v962_v11  ;;  %v964_v19 = vld [vmem:[%s1908_s1 + $0xd0] sm:$0xf0]  ;;  %v1304_v20 = vld [vmem:[%s1908_s1 + $0x1c4] sm:$0xf] }
   0x6   :  { %v1091_v17 = vor.u32 %v1306_v15, %v1090_v14  ;;  %461 = vmatpush.bf16.msra.mxu3 %v1111_v12  ;;  %v967_v21 = vor.u32 %v1272_v18, %v964_v19  ;;  %v1092_v22 = vld [vmem:[%s1908_s1 + $0x1d0] sm:$0xf0]  ;;  %v946_v23 = vld [vmem:[%s1908_s1 + $0xa0] sm:$0xf]  ;;  %v1270_v24 = vld [vmem:[%s1908_s1 + $0xac] sm:$0xf0] }
   0x7   :  { %v1095_v25 = vor.u32 %v1304_v20, %v1092_v22  ;;  %v1074_v26 = vld [vmem:[%s1908_s1 + $0x1a0] sm:$0xf]  ;;  %v1302_v27 = vld [vmem:[%s1908_s1 + $0x1ac] sm:$0xf0]  ;;  %v1268_v28 = vld [vmem:[%s1908_s1 + $0xa4] sm:$0xf]  ;;  %v947_v29 = vor.u32 %v1270_v24, %v946_v23 }
   0x8   :  { %423 = vmatpush.bf16.msra.mxu0 %v963_v16  ;;  %v948_v30 = vld [vmem:[%s1908_s1 + $0xb0] sm:$0xf0]  ;;  %v1300_v31 = vld [vmem:[%s1908_s1 + $0x1a4] sm:$0xf]  ;;  %v1075_v33 = vor.u32 %v1302_v27, %v1074_v26  ;;  %v930_v35 = vld [vmem:[%s1908_s1 + $0x80] sm:$0xf] }
   0x9   :  { %v1076_v32 = vld [vmem:[%s1908_s1 + $0x1b0] sm:$0xf0]  ;;  %436 = vmatpush.bf16.msra.mxu1 %v1091_v17  ;;  %449 = vmatpush.bf16.msra.mxu2 %v967_v21  ;;  %v951_v34 = vor.u32 %v1268_v28, %v948_v30  ;;  %v1266_v36 = vld [vmem:[%s1908_s1 + $0x8c] sm:$0xf0]  ;;  %v1058_v37 = vld [vmem:[%s1908_s1 + $0x180] sm:$0xf] }
   0xa   :  { %462 = vmatpush.bf16.msra.mxu3 %v1095_v25  ;;  %v1079_v38 = vor.u32 %v1300_v31, %v1076_v32  ;;  %v1298_v39 = vld [vmem:[%s1908_s1 + $0x18c] sm:$0xf0]  ;;  %v1264_v40 = vld [vmem:[%s1908_s1 + $0x84] sm:$0xf]  ;;  %v932_v41 = vld [vmem:[%s1908_s1 + $0x90] sm:$0xf0]  ;;  %v931_v44 = vor.u32 %v1266_v36, %v930_v35 }
   0xb   :  { %v1296_v42 = vld [vmem:[%s1908_s1 + $0x184] sm:$0xf]  ;;  %v1060_v43 = vld [vmem:[%s1908_s1 + $0x190] sm:$0xf0]  ;;  %v1059_v45 = vor.u32 %v1298_v39, %v1058_v37  ;;  %v935_v46 = vor.u32 %v1264_v40, %v932_v41  ;;  %v914_v47 = vld [vmem:[%s1908_s1 + $0x60] sm:$0xf] }
   0xc   :  { %424 = vmatpush.bf16.msra.mxu0 %v947_v29  ;;  %v1262_v48 = vld [vmem:[%s1908_s1 + $0x6c] sm:$0xf0]  ;;  %v1042_v49 = vld [vmem:[%s1908_s1 + $0x160] sm:$0xf]  ;;  %v1063_v50 = vor.u32 %v1296_v42, %v1060_v43  ;;  %v1260_v52 = vld [vmem:[%s1908_s1 + $0x64] sm:$0xf] }
   0xd   :  { %437 = vmatpush.bf16.msra.mxu1 %v1075_v33  ;;  %450 = vmatpush.bf16.msra.mxu2 %v951_v34  ;;  %v1294_v51 = vld [vmem:[%s1908_s1 + $0x16c] sm:$0xf0]  ;;  %v916_v53 = vld [vmem:[%s1908_s1 + $0x70] sm:$0xf0]  ;;  %v1292_v54 = vld [vmem:[%s1908_s1 + $0x164] sm:$0xf]  ;;  %v915_v56 = vor.u32 %v1262_v48, %v914_v47 }
   0xe   :  { %463 = vmatpush.bf16.msra.mxu3 %v1079_v38  ;;  %v1044_v55 = vld [vmem:[%s1908_s1 + $0x170] sm:$0xf0]  ;;  %v1043_v57 = vor.u32 %v1294_v51, %v1042_v49  ;;  %v919_v58 = vor.u32 %v1260_v52, %v916_v53  ;;  %v898_v59 = vld [vmem:[%s1908_s1 + $0x40] sm:$0xf]  ;;  %v1258_v60 = vld [vmem:[%s1908_s1 + $0x4c] sm:$0xf0] }
   0xf   :  { %v1026_v61 = vld [vmem:[%s1908_s1 + $0x140] sm:$0xf]  ;;  %v1047_v62 = vor.u32 %v1292_v54, %v1044_v55  ;;  %v1290_v63 = vld [vmem:[%s1908_s1 + $0x14c] sm:$0xf0]  ;;  %v1256_v0 = vld [vmem:[%s1908_s1 + $0x44] sm:$0xf]  ;;  %v899_v4 = vor.u32 %v1258_v60, %v898_v59 }
  0x10   :  { %425 = vmatpush.bf16.msra.mxu0 %v931_v44  ;;  %v900_v1 = vld [vmem:[%s1908_s1 + $0x50] sm:$0xf0]  ;;  %v1288_v2 = vld [vmem:[%s1908_s1 + $0x144] sm:$0xf]  ;;  %v1027_v5 = vor.u32 %v1290_v63, %v1026_v61  ;;  %v882_v7 = vld [vmem:[%s1908_s1 + $0x20] sm:$0xf] }
  0x11   :  { %438 = vmatpush.bf16.msra.mxu1 %v1059_v45  ;;  %451 = vmatpush.bf16.msra.mxu2 %v935_v46  ;;  %v1028_v3 = vld [vmem:[%s1908_s1 + $0x150] sm:$0xf0]  ;;  %v903_v6 = vor.u32 %v1256_v0, %v900_v1  ;;  %v1254_v8 = vld [vmem:[%s1908_s1 + $0x2c] sm:$0xf0]  ;;  %v1010_v9 = vld [vmem:[%s1908_s1 + $0x120] sm:$0xf] }
  0x12   :  { %464 = vmatpush.bf16.msra.mxu3 %v1063_v50  ;;  %v1031_v10 = vor.u32 %v1288_v2, %v1028_v3  ;;  %v1286_v11 = vld [vmem:[%s1908_s1 + $0x12c] sm:$0xf0]  ;;  %v1252_v12 = vld [vmem:[%s1908_s1 + $0x24] sm:$0xf]  ;;  %v884_v13 = vld [vmem:[%s1908_s1 + $0x30] sm:$0xf0]  ;;  %v883_v17 = vor.u32 %v1254_v8, %v882_v7 }
  0x13   :  { %v1284_v14 = vld [vmem:[%s1908_s1 + $0x124] sm:$0xf]  ;;  %v1012_v15 = vld [vmem:[%s1908_s1 + $0x130] sm:$0xf0]  ;;  %v866_v16 = vld [vmem:[%s1908_s1] sm:$0xf]  ;;  %v1011_v21 = vor.u32 %v1286_v11, %v1010_v9  ;;  %v887_v22 = vor.u32 %v1252_v12, %v884_v13 }
  0x14   :  { %426 = vmatpush.bf16.msra.mxu0 %v915_v56  ;;  %v1250_v18 = vld [vmem:[%s1908_s1 + $0xc] sm:$0xf0]  ;;  %v994_v19 = vld [vmem:[%s1908_s1 + $0x100] sm:$0xf]  ;;  %v1248_v23 = vld [vmem:[%s1908_s1 + $0x4] sm:$0xf]  ;;  %v1015_v26 = vor.u32 %v1284_v14, %v1012_v15 }
  0x15   :  { %439 = vmatpush.bf16.msra.mxu1 %v1043_v57  ;;  %452 = vmatpush.bf16.msra.mxu2 %v919_v58  ;;  %v1282_v20 = vld [vmem:[%s1908_s1 + $0x10c] sm:$0xf0]  ;;  %v868_v24 = vld [vmem:[%s1908_s1 + $0x10] sm:$0xf0]  ;;  %v1280_v25 = vld [vmem:[%s1908_s1 + $0x104] sm:$0xf]  ;;  %v867_v33 = vor.u32 %v1250_v18, %v866_v16 }
  0x16   :  { %465 = vmatpush.bf16.msra.mxu3 %v1047_v62  ;;  %v996_v27 = vld [vmem:[%s1908_s1 + $0x110] sm:$0xf0]  ;;  %v986_v28 = vld [vmem:[%s1908_s1 + $0xe8] sm:$0xf]  ;;  %v1279_v29 = vld [vmem:[%s1908_s1 + $0xf4] sm:$0xf0]  ;;  %v995_v36 = vor.u32 %v1282_v20, %v994_v19  ;;  %v871_v37 = vor.u32 %v1248_v23, %v868_v24 }
  0x17   :  { %v1114_v30 = vld [vmem:[%s1908_s1 + $0x1e8] sm:$0xf]  ;;  %v1311_v31 = vld [vmem:[%s1908_s1 + $0x1f4] sm:$0xf0]  ;;  %v21_v32 = vld [vmem:[%s1907_s0] sm:$0x3]  ;;  %v999_v40 = vor.u32 %v1280_v25, %v996_v27  ;;  %v987_v41 = vor.u32 %v1279_v29, %v986_v28 }
  0x18   :  { %427 = vmatpush.bf16.msra.mxu0 %v899_v4  ;;  %v1277_v34 = vld [vmem:[%s1908_s1 + $0xec] sm:$0xf]  ;;  %v988_v35 = vld [vmem:[%s1908_s1 + $0xf8] sm:$0xf0]  ;;  %97 = vst [vmem:[#allocation1] ss:$9 sm:$0xff] %v21_v32  ;;  %v1115_v42 = vor.u32 %v1311_v31, %v1114_v30 }
  0x19   :  { %440 = vmatpush.bf16.msra.mxu1 %v1027_v5  ;;  %453 = vmatpush.bf16.msra.mxu2 %v903_v6  ;;  %v1309_v38 = vld [vmem:[%s1908_s1 + $0x1ec] sm:$0xf]  ;;  %v1116_v39 = vld [vmem:[%s1908_s1 + $0x1f8] sm:$0xf0]  ;;  %v991_v43 = vor.u32 %v1277_v34, %v988_v35  ;;  %v970_v44 = vld [vmem:[%s1908_s1 + $0xc8] sm:$0xf] }
  0x1a   :  { %466 = vmatpush.bf16.msra.mxu3 %v1031_v10  ;;  %v1275_v45 = vld [vmem:[%s1908_s1 + $0xd4] sm:$0xf0]  ;;  %v1098_v46 = vld [vmem:[%s1908_s1 + $0x1c8] sm:$0xf]  ;;  %v1119_v47 = vor.u32 %v1309_v38, %v1116_v39  ;;  %v1273_v49 = vld [vmem:[%s1908_s1 + $0xcc] sm:$0xf] }
  0x1b   :  { %v1307_v48 = vld [vmem:[%s1908_s1 + $0x1d4] sm:$0xf0]  ;;  %v972_v50 = vld [vmem:[%s1908_s1 + $0xd8] sm:$0xf0]  ;;  %v1305_v51 = vld [vmem:[%s1908_s1 + $0x1cc] sm:$0xf]  ;;  %v971_v53 = vor.u32 %v1275_v45, %v970_v44 }
  0x1c   :  { %428 = vmatpush.bf16.msra.mxu0 %v883_v17  ;;  %v1100_v52 = vld [vmem:[%s1908_s1 + $0x1d8] sm:$0xf0]  ;;  %v954_v54 = vld [vmem:[%s1908_s1 + $0xa8] sm:$0xf]  ;;  %v1271_v55 = vld [vmem:[%s1908_s1 + $0xb4] sm:$0xf0]  ;;  %v1099_v56 = vor.u32 %v1307_v48, %v1098_v46  ;;  %v975_v57 = vor.u32 %v1273_v49, %v972_v50 }
  0x1d   :  { %441 = vmatpush.bf16.msra.mxu1 %v1011_v21  ;;  %454 = vmatpush.bf16.msra.mxu2 %v887_v22  ;;  %v1082_v59 = vld [vmem:[%s1908_s1 + $0x1a8] sm:$0xf]  ;;  %v1103_v61 = vor.u32 %v1305_v51, %v1100_v52  ;;  %v1303_v62 = vld [vmem:[%s1908_s1 + $0x1b4] sm:$0xf0]  ;;  %v1269_v63 = vld [vmem:[%s1908_s1 + $0xac] sm:$0xf]  ;;  %v955_v3 = vor.u32 %v1271_v55, %v954_v54 }
  0x1e   :  { %467 = vmatpush.bf16.msra.mxu3 %v1015_v26  ;;  %v956_v0 = vld [vmem:[%s1908_s1 + $0xb8] sm:$0xf0]  ;;  %v1301_v1 = vld [vmem:[%s1908_s1 + $0x1ac] sm:$0xf]  ;;  %v1083_v4 = vor.u32 %v1303_v62, %v1082_v59  ;;  %v938_v6 = vld [vmem:[%s1908_s1 + $0x88] sm:$0xf] }
  0x1f   :  { %v1652_v58 = vld [vmem:[#allocation1] sm:$0xff]  ;;  %v1657_v60 = vld [vmem:[#allocation1 + $0x9] sm:$0xff]  ;;  %v1084_v2 = vld [vmem:[%s1908_s1 + $0x1b8] sm:$0xf0]  ;;  %v959_v5 = vor.u32 %v1269_v63, %v956_v0 }
  0x20   :  { %429 = vmatpush.bf16.msra.mxu0 %v867_v33  ;;  %v1267_v7 = vld [vmem:[%s1908_s1 + $0x94] sm:$0xf0]  ;;  %v1066_v8 = vld [vmem:[%s1908_s1 + $0x188] sm:$0xf]  ;;  %v1087_v9 = vor.u32 %v1301_v1, %v1084_v2  ;;  %v1265_v11 = vld [vmem:[%s1908_s1 + $0x8c] sm:$0xf] }
  0x21   :  { %442 = vmatpush.bf16.msra.mxu1 %v995_v36  ;;  %455 = vmatpush.bf16.msra.mxu2 %v871_v37  ;;  %v1299_v10 = vld [vmem:[%s1908_s1 + $0x194] sm:$0xf0]  ;;  %v940_v12 = vld [vmem:[%s1908_s1 + $0x98] sm:$0xf0]  ;;  %v1297_v13 = vld [vmem:[%s1908_s1 + $0x18c] sm:$0xf]  ;;  %v939_v15 = vor.u32 %v1267_v7, %v938_v6 }
  0x22   :  { %468 = vmatpush.bf16.msra.mxu3 %v999_v40  ;;  %v1068_v14 = vld [vmem:[%s1908_s1 + $0x198] sm:$0xf0]  ;;  %v1067_v16 = vor.u32 %v1299_v10, %v1066_v8  ;;  %v943_v17 = vor.u32 %v1265_v11, %v940_v12  ;;  %v922_v18 = vld [vmem:[%s1908_s1 + $0x68] sm:$0xf]  ;;  %v1263_v19 = vld [vmem:[%s1908_s1 + $0x74] sm:$0xf0] }
  0x23   :  { %430 = vmatmul.bf16.vlgmr.msra.gmra.mxu0 %v1652_v58  ;;  %v1050_v20 = vld [vmem:[%s1908_s1 + $0x168] sm:$0xf]  ;;  %v1071_v21 = vor.u32 %v1297_v13, %v1068_v14  ;;  %v1295_v22 = vld [vmem:[%s1908_s1 + $0x174] sm:$0xf0]  ;;  %v1261_v23 = vld [vmem:[%s1908_s1 + $0x6c] sm:$0xf]  ;;  %v923_v27 = vor.u32 %v1263_v19, %v922_v18 }
  0x24   :  { %474 = vmatpush.bf16.msrb.mxu0 %v987_v41  ;;  %456 = vmatmul.bf16.vlgmr.msra.gmra.mxu2 %v1652_v58  ;;  %v924_v24 = vld [vmem:[%s1908_s1 + $0x78] sm:$0xf0]  ;;  %v1293_v25 = vld [vmem:[%s1908_s1 + $0x16c] sm:$0xf]  ;;  %v906_v28 = vld [vmem:[%s1908_s1 + $0x48] sm:$0xf]  ;;  %v1051_v30 = vor.u32 %v1295_v22, %v1050_v20 }
  0x25   :  { %487 = vmatpush.bf16.msrb.mxu1 %v1115_v42  ;;  %500 = vmatpush.bf16.msrb.mxu2 %v991_v43  ;;  %v1052_v26 = vld [vmem:[%s1908_s1 + $0x178] sm:$0xf0]  ;;  %v1259_v29 = vld [vmem:[%s1908_s1 + $0x54] sm:$0xf0]  ;;  %v927_v31 = vor.u32 %v1261_v23, %v924_v24  ;;  %v1034_v32 = vld [vmem:[%s1908_s1 + $0x148] sm:$0xf] }
  0x26   :  { %513 = vmatpush.bf16.msrb.mxu3 %v1119_v47  ;;  %443 = vmatmul.bf16.vlgmr.msra.gmra.mxu1 %v1657_v60  ;;  %v1291_v33 = vld [vmem:[%s1908_s1 + $0x154] sm:$0xf0]  ;;  %v1257_v34 = vld [vmem:[%s1908_s1 + $0x4c] sm:$0xf]  ;;  %v1055_v35 = vor.u32 %v1293_v25, %v1052_v26  ;;  %v908_v36 = vld [vmem:[%s1908_s1 + $0x58] sm:$0xf0] }
  0x27   :  { %469 = vmatmul.bf16.vlgmr.msra.gmra.mxu3 %v1657_v60 }
  0x28   :  { %475 = vmatpush.bf16.msrb.mxu0 %v971_v53 }
  0x29   :  { %488 = vmatpush.bf16.msrb.mxu1 %v1099_v56  ;;  %501 = vmatpush.bf16.msrb.mxu2 %v975_v57 }
  0x2a   :  { %514 = vmatpush.bf16.msrb.mxu3 %v1103_v61 }
  0x2c   :  { %476 = vmatpush.bf16.msrb.mxu0 %v955_v3 }
  0x2d   :  { %489 = vmatpush.bf16.msrb.mxu1 %v1083_v4  ;;  %502 = vmatpush.bf16.msrb.mxu2 %v959_v5 }
  0x2e   :  { %515 = vmatpush.bf16.msrb.mxu3 %v1087_v9 }
  0x30   :  { %477 = vmatpush.bf16.msrb.mxu0 %v939_v15 }
  0x31   :  { %490 = vmatpush.bf16.msrb.mxu1 %v1067_v16  ;;  %503 = vmatpush.bf16.msrb.mxu2 %v943_v17 }
  0x32   :  { %516 = vmatpush.bf16.msrb.mxu3 %v1071_v21 }
  0x33   :  { %10 = vsyncpa [#allocation3], 0  ;;  %v1289_v37 = vld [vmem:[%s1908_s1 + $0x14c] sm:$0xf]  ;;  %v1036_v38 = vld [vmem:[%s1908_s1 + $0x158] sm:$0xf0]  ;;  %v907_v39 = vor.u32 %v1259_v29, %v906_v28  ;;  %v1035_v40 = vor.u32 %v1291_v33, %v1034_v32  ;;  %v911_v41 = vor.u32 %v1257_v34, %v908_v36 }
  0x34   :  { %478 = vmatpush.bf16.msrb.mxu0 %v923_v27  ;;  %v890_v42 = vld [vmem:[%s1908_s1 + $0x28] sm:$0xf]  ;;  %v1255_v43 = vld [vmem:[%s1908_s1 + $0x34] sm:$0xf0]  ;;  %v1039_v45 = vor.u32 %v1289_v37, %v1036_v38  ;;  %v1253_v47 = vld [vmem:[%s1908_s1 + $0x2c] sm:$0xf] }
  0x35   :  { %491 = vmatpush.bf16.msrb.mxu1 %v1051_v30  ;;  %504 = vmatpush.bf16.msrb.mxu2 %v927_v31  ;;  %v1018_v44 = vld [vmem:[%s1908_s1 + $0x128] sm:$0xf]  ;;  %v1287_v46 = vld [vmem:[%s1908_s1 + $0x134] sm:$0xf0]  ;;  %v892_v48 = vld [vmem:[%s1908_s1 + $0x38] sm:$0xf0]  ;;  %v891_v51 = vor.u32 %v1255_v43, %v890_v42 }
  0x36   :  { %517 = vmatpush.bf16.msrb.mxu3 %v1055_v35  ;;  %v1285_v49 = vld [vmem:[%s1908_s1 + $0x12c] sm:$0xf]  ;;  %v1020_v50 = vld [vmem:[%s1908_s1 + $0x138] sm:$0xf0]  ;;  %v1019_v52 = vor.u32 %v1287_v46, %v1018_v44  ;;  %v895_v53 = vor.u32 %v1253_v47, %v892_v48  ;;  %v874_v54 = vld [vmem:[%s1908_s1 + $0x8] sm:$0xf] }
  0x37   :  { %v1251_v55 = vld [vmem:[%s1908_s1 + $0x14] sm:$0xf0]  ;;  %v1002_v56 = vld [vmem:[%s1908_s1 + $0x108] sm:$0xf]  ;;  %v1023_v57 = vor.u32 %v1285_v49, %v1020_v50  ;;  %v1249_v61 = vld [vmem:[%s1908_s1 + $0xc] sm:$0xf] }
  0x38   :  { %479 = vmatpush.bf16.msrb.mxu0 %v907_v39  ;;  %v1283_v59 = vld [vmem:[%s1908_s1 + $0x114] sm:$0xf0]  ;;  %v876_v62 = vld [vmem:[%s1908_s1 + $0x18] sm:$0xf0]  ;;  %v1281_v63 = vld [vmem:[%s1908_s1 + $0x10c] sm:$0xf]  ;;  %v875_v1 = vor.u32 %v1251_v55, %v874_v54 }
  0x39   :  { %492 = vmatpush.bf16.msrb.mxu1 %v1035_v40  ;;  %505 = vmatpush.bf16.msrb.mxu2 %v911_v41  ;;  %v1004_v0 = vld [vmem:[%s1908_s1 + $0x118] sm:$0xf0]  ;;  %v1003_v2 = vor.u32 %v1283_v59, %v1002_v56  ;;  %v879_v3 = vor.u32 %v1249_v61, %v876_v62  ;;  %v1318_v8 = vld [vmem:[%s1910_s3 + $0x30] sm:$0xff]  ;;  %v1317_v10 = vld [vmem:[%s1910_s3 + $0x28] sm:$0xff]  ;;  %s1372_s7 = smov [#allocation2]   ;;  %s855_s11 = sshll.u32 %s1912_s5, 4  ;;  %s856_s11 = int_to_ptr.hbm [resolvable:$true] %s855_s11 }
  0x3a   :  { %518 = vmatpush.bf16.msrb.mxu3 %v1039_v45  ;;  %v1007_v4 = vor.u32 %v1281_v63, %v1004_v0  ;;  %v1319_v5 = vld [vmem:[%s1910_s3 + $0x38] sm:$0xff]  ;;  %v1326_v9 = vld [vmem:[%s1910_s3 + $0x70] sm:$0xff]  ;;  %v1325_v11 = vld [vmem:[%s1910_s3 + $0x68] sm:$0xff]  ;;  %s853_s8 = sshll.u32 %s1372_s7, 4  ;;  %vm846_vm0 = vcmask 41984   ;;  %s854_s8 = int_to_ptr.vmem [resolvable:$true] %s853_s8 }
  0x3b   :  { %v1327_v6 = vld [vmem:[%s1910_s3 + $0x78] sm:$0xff]  ;;  %v1316_v12 = vld [vmem:[%s1910_s3 + $0x20] sm:$0xff]  ;;  %v1314_v14 = vld [vmem:[%s1910_s3 + $0x10] sm:$0xff] }
  0x3c   :  { %480 = vmatpush.bf16.msrb.mxu0 %v891_v51  ;;  %v1335_v7 = vld [vmem:[%s1910_s3 + $0xb8] sm:$0xff]  ;;  %v1322_v15 = vld [vmem:[%s1910_s3 + $0x50] sm:$0xff]  ;;  %v1313_v17 = vld [vmem:[%s1910_s3 + $0x8] sm:$0xff] }
  0x3d   :  { %493 = vmatpush.bf16.msrb.mxu1 %v1019_v52  ;;  %506 = vmatpush.bf16.msrb.mxu2 %v895_v53  ;;  %v1323_v13 = vld [vmem:[%s1910_s3 + $0x58] sm:$0xff]  ;;  %v1334_v16 = vld [vmem:[%s1910_s3 + $0xb0] sm:$0xff]  ;;  %v1321_v18 = vld [vmem:[%s1910_s3 + $0x48] sm:$0xff] }
  0x3e   :  { %519 = vmatpush.bf16.msrb.mxu3 %v1023_v57  ;;  %v1343_v19 = vld [vmem:[%s1910_s3 + $0xf8] sm:$0xff]  ;;  %v1333_v20 = vld [vmem:[%s1910_s3 + $0xa8] sm:$0xff]  ;;  %v1312_v21 = vld [vmem:[%s1910_s3] sm:$0xff] }
  0x3f   :  { %v1320_v22 = vld [vmem:[%s1910_s3 + $0x40] sm:$0xff]  ;;  %v1342_v23 = vld [vmem:[%s1910_s3 + $0xf0] sm:$0xff]  ;;  %v1341_v25 = vld [vmem:[%s1910_s3 + $0xe8] sm:$0xff] }
  0x40   :  { %481 = vmatpush.bf16.msrb.mxu0 %v875_v1  ;;  %v1332_v24 = vld [vmem:[%s1910_s3 + $0xa0] sm:$0xff]  ;;  %v1331_v26 = vld [vmem:[%s1910_s3 + $0x98] sm:$0xff]  ;;  %v1330_v28 = vld [vmem:[%s1910_s3 + $0x90] sm:$0xff] }
  0x41   :  { %494 = vmatpush.bf16.msrb.mxu1 %v1003_v2  ;;  %507 = vmatpush.bf16.msrb.mxu2 %v879_v3  ;;  %v1340_v27 = vld [vmem:[%s1910_s3 + $0xe0] sm:$0xff]  ;;  %v1339_v30 = vld [vmem:[%s1910_s3 + $0xd8] sm:$0xff]  ;;  %v1329_v32 = vld [vmem:[%s1910_s3 + $0x88] sm:$0xff] }
  0x42   :  { %520 = vmatpush.bf16.msrb.mxu3 %v1007_v4  ;;  %v86_v29 = vld [vmem:[%s1909_s2] sm:$0xf]  ;;  %v1338_v34 = vld [vmem:[%s1910_s3 + $0xd0] sm:$0xff]  ;;  %v1337_v40 = vld [vmem:[%s1910_s3 + $0xc8] sm:$0xff] }
  0x43   :  { %482 = vmatmul.bf16.vlgmr.msrb.gmra.mxu0 %v1652_v58  ;;  %v88_v31 = vperm.slane %v86_v29, 0  ;;  %v89_v37 = vperm.slane %v86_v29, 1  ;;  %v1328_v38 = vld [vmem:[%s1910_s3 + $0x80] sm:$0xff]  ;;  %v90_v54 = vperm.slane %v86_v29, 2  ;;  %v91_v61 = vperm.slane %v86_v29, 3 }
  0x44   :  { %794 = vmatpush.bf16.msra.mxu0 %v1319_v5  ;;  %495 = vmatmul.bf16.vlgmr.msrb.gmra.mxu1 %v1657_v60  ;;  %v1336_v48 = vld [vmem:[%s1910_s3 + $0xc0] sm:$0xff] }
  0x45   :  { %807 = vmatpush.bf16.msra.mxu1 %v1327_v6  ;;  %508 = vmatmul.bf16.vlgmr.msrb.gmra.mxu2 %v1652_v58  ;;  %v1324_v58 = vld [vmem:[%s1910_s3 + $0x60] sm:$0xff] }
  0x46   :  { %521 = vmatmul.bf16.vlgmr.msrb.gmra.mxu3 %v1657_v60  ;;  %820 = vmatpush.bf16.msra.mxu2 %v1335_v7  ;;  %v1315_v60 = vld [vmem:[%s1910_s3 + $0x18] sm:$0xff] }
  0x47   :  { %833 = vmatpush.bf16.msra.mxu3 %v1343_v19 }
  0x48   :  { %795 = vmatpush.bf16.msra.mxu0 %v1318_v8 }
  0x49   :  { %808 = vmatpush.bf16.msra.mxu1 %v1326_v9 }
  0x4a   :  { %821 = vmatpush.bf16.msra.mxu2 %v1334_v16 }
  0x4b   :  { %834 = vmatpush.bf16.msra.mxu3 %v1342_v23 }
  0x4c   :  { %796 = vmatpush.bf16.msra.mxu0 %v1317_v10 }
  0x4d   :  { %809 = vmatpush.bf16.msra.mxu1 %v1325_v11 }
  0x4e   :  { %822 = vmatpush.bf16.msra.mxu2 %v1333_v20 }
  0x4f   :  { %835 = vmatpush.bf16.msra.mxu3 %v1341_v25 }
  0x50   :  { %797 = vmatpush.bf16.msra.mxu0 %v1316_v12 }
  0x51   :  { %810 = vmatpush.bf16.msra.mxu1 %v1324_v58 }
  0x52   :  { %823 = vmatpush.bf16.msra.mxu2 %v1332_v24 }
  0x53   :  { %836 = vmatpush.bf16.msra.mxu3 %v1340_v27 }
  0x54   :  { %798 = vmatpush.bf16.msra.mxu0 %v1315_v60  ;;  %v1345_v60 = vld [vmem:[%s1911_s4] ss:$0 sm:$0xff] }
  0x55   :  { %811 = vmatpush.bf16.msra.mxu1 %v1323_v13 }
  0x56   :  { %824 = vmatpush.bf16.msra.mxu2 %v1331_v26 }
  0x57   :  { %837 = vmatpush.bf16.msra.mxu3 %v1339_v30 }
  0x58   :  { %799 = vmatpush.bf16.msra.mxu0 %v1314_v14 }
  0x59   :  { %812 = vmatpush.bf16.msra.mxu1 %v1322_v15 }
  0x5a   :  { %825 = vmatpush.bf16.msra.mxu2 %v1330_v28 }
  0x5b   :  { %838 = vmatpush.bf16.msra.mxu3 %v1338_v34 }
  0x5c   :  { %800 = vmatpush.bf16.msra.mxu0 %v1313_v17 }
  0x5d   :  { %813 = vmatpush.bf16.msra.mxu1 %v1321_v18 }
  0x5e   :  { %826 = vmatpush.bf16.msra.mxu2 %v1329_v32 }
  0x5f   :  { %839 = vmatpush.bf16.msra.mxu3 %v1337_v40 }
  0x60   :  { %801 = vmatpush.bf16.msra.mxu0 %v1312_v21 }
  0x61   :  { %814 = vmatpush.bf16.msra.mxu1 %v1320_v22 }
  0x62   :  { %827 = vmatpush.bf16.msra.mxu2 %v1328_v38 }
  0x63   :  { %840 = vmatpush.bf16.msra.mxu3 %v1336_v48 }
  0xa0   :  { %v431_v33 = vpop.f32.mrf.mxu0 }
  0xa1   :  { %v432_v35 = vadd.f32 %v431_v33, %v88_v31 }
  0xa3   :  { %v444_v36 = vpop.f32.mrf.mxu1 }
  0xa4   :  { %v445_v39 = vadd.f32 %v444_v36, %v432_v35 }
  0xa6   :  { %v526_v42 = vmax.f32 %v445_v39, 0.0 }
  0xa7   :  { %v457_v41 = vpop.f32.mrf.mxu2 }
  0xa8   :  { %v458_v43 = vadd.f32 %v457_v41, %v89_v37  ;;  %v530_v45 = vpack.c.bf16 %v526_v42, %v526_v42  ;;  %v433_v47 = vpop.f32.mrf.mxu0 }
  0xaa   :  { %v470_v44 = vpop.f32.mrf.mxu3  ;;  %802 = vmatmul.bf16.vlgmr.msra.gmra.mxu0 %v530_v45 }
  0xab   :  { %v471_v46 = vadd.f32 %v470_v44, %v458_v43  ;;  %v446_v49 = vpop.f32.mrf.mxu1 }
  0xad   :  { %v527_v50 = vmax.f32 %v471_v46, 0.0 }
  0xaf   :  { %v531_v51 = vpack.c.bf16 %v527_v50, %v527_v50  ;;  %v459_v52 = vpop.f32.mrf.mxu2 }
  0xb1   :  { %815 = vmatmul.bf16.vlgmr.msra.gmra.mxu1 %v531_v51 }
  0xb2   :  { %v472_v53 = vpop.f32.mrf.mxu3 }
  0xc0   :  { %v483_v55 = vpop.f32.mrf.mxu0 }
  0xc1   :  { %v484_v56 = vadd.f32 %v483_v55, %v90_v54  ;;  %v496_v57 = vpop.f32.mrf.mxu1 }
  0xc3   :  { %v497_v59 = vadd.f32 %v496_v57, %v484_v56 }
  0xc5   :  { %v528_v62 = vmax.f32 %v497_v59, 0.0 }
  0xc7   :  { %v532_v63 = vpack.c.bf16 %v528_v62, %v528_v62 }
  0xc8   :  { %v509_v0 = vpop.f32.mrf.mxu2  ;;  %v485_v3 = vpop.f32.mrf.mxu0 }
  0xc9   :  { %v510_v1 = vadd.f32 %v509_v0, %v91_v61  ;;  %v522_v2 = vpop.f32.mrf.mxu3  ;;  %v498_v4 = vpop.f32.mrf.mxu1  ;;  %828 = vmatmul.bf16.vlgmr.msra.gmra.mxu2 %v532_v63 }
  0xcb   :  { %v523_v5 = vadd.f32 %v522_v2, %v510_v1 }
  0xcd   :  { %v529_v6 = vmax.f32 %v523_v5, 0.0 }
  0xcf   :  { %v533_v7 = vpack.c.bf16 %v529_v6, %v529_v6 }
  0xd0   :  { %v511_v8 = vpop.f32.mrf.mxu2 }
  0xd1   :  { %v524_v9 = vpop.f32.mrf.mxu3  ;;  %841 = vmatmul.bf16.vlgmr.msra.gmra.mxu3 %v533_v7 }
 0x127   :  { %v803_v10 = vpop.f32.mrf.mxu0 }
 0x128   :  { %v804_v13 = vadd.f32 %v1345_v60, %v803_v10 }
 0x12e   :  { %v816_v11 = vpop.f32.mrf.mxu1 }
 0x12f   :  { %v805_v12 = vpop.f32.mrf.mxu0  ;;  %v817_v15 = vadd.f32 %v816_v11, %v804_v13 }
 0x136   :  { %v818_v58 = vpop.f32.mrf.mxu1 }
 0x14c   :  { %v829_v14 = vpop.f32.mrf.mxu2 }
 0x14d   :  { %v830_v16 = vadd.f32 %v829_v14, %v817_v15 }
 0x154   :  { %v842_v17 = vpop.f32.mrf.mxu3  ;;  %v831_v19 = vpop.f32.mrf.mxu2 }
 0x155   :  { %v843_v18 = vadd.f32 %v842_v17, %v830_v16 }
 0x157   :  { %847 = vst.msk [vmem:[#allocation2] sm:$0x3] %vm846_vm0, %v843_v18 }
 0x158   :  { %858 = dma.vmem_to_hbm [thread:$0]  %s854_s8, 32, %s856_s11, [#allocation3]  }
 0x15c   :  { %v844_v20 = vpop.f32.mrf.mxu3 }
 0x15d   :  { %1370 = dma.done.wait [#allocation3], 32  }
 0x15e   :  { %1371 = vsyncadd [#allocation3], 4294967264 }
 0x15f   :  { %863 = vsyncpa [#allocation3], 1 }

</bundles_post_ra>
